<compile_context>
chip_gen: v6e
topology: v6e:2x2x1
jax: 0.10.0
libtpu: 0.0.40
codegen_flags: <defaults>
</compile_context>

<pallas_src>
import jax
import jax.numpy as jnp
from jax.experimental import pallas as pl
from jax.experimental.pallas import tpu as pltpu

_LANES = 128
_TARGET_TILE_BYTES = 2 * 1024 * 1024     # ~2 MiB input tile per grid step
_MIN_GRID_STEPS = 8                      # keep the pipeline (and 2nd TC) busy


def _round_up(x, m):
    return ((x + m - 1) // m) * m


def _sublane_multiple(itemsize):
    # Packed sublane tiling: f32 -> 8, bf16 -> 16, int8/fp8 -> 32.
    return {4: 8, 2: 16, 1: 32}.get(itemsize, 8)


def _pick_block_rows(rows, itemsize):
    sub = _sublane_multiple(itemsize)
    if rows <= sub:
        # Tiny input: a single full-array block (block dims == array dims).
        return rows
    base = max(sub, _TARGET_TILE_BYTES // (_LANES * itemsize))  # 4096 f32 / 8192 bf16
    depth_cap = _round_up(pl.cdiv(rows, _MIN_GRID_STEPS), sub)  # >= ~8 grid steps
    br = min(base, depth_cap, _round_up(rows, sub))
    return max(sub, br)


def _laplace_density_kernel(scalars_ref, sdf_ref, out_ref):
    # scalars_ref: SMEM f32[3] = [0.5*alpha, alpha, -alpha]
    half_alpha = scalars_ref[0]
    alpha = scalars_ref[1]
    neg_alpha = scalars_ref[2]
    x = sdf_ref[...].astype(jnp.float32)
    e = jnp.exp(jnp.abs(x) * neg_alpha)                       # exp(-|x| / beta), EUP
    out = jnp.where(x >= 0.0, half_alpha * e, alpha - half_alpha * e)
    out_ref[...] = out.astype(out_ref.dtype)


def laplace_density(sdf, beta_param, beta=None, beta_min=1e-4):
    """Pallas implementation of LaplaceDensity.forward(sdf, beta=None)."""
    orig_shape = sdf.shape
    dtype = sdf.dtype
    itemsize = jnp.dtype(dtype).itemsize

    flat = sdf.reshape(-1)
    n = flat.shape[0]
    rows = pl.cdiv(n, _LANES)
    n_lane_padded = rows * _LANES

    # Only a <=127-element tail pad when n isn't lane-aligned; no block-multiple
    # padding (Pallas masks the trailing partial row-block).
    if n_lane_padded != n:
        flat = jnp.pad(flat, (0, n_lane_padded - n))
    x2d = flat.reshape(rows, _LANES)

    # Scalar setup, done once in the wrapper.
    if beta is None:
        beta_val = (jnp.abs(jnp.asarray(beta_param, jnp.float32))
                    + jnp.asarray(beta_min, jnp.float32))
    else:
        # Explicit beta supplied: use as-is (matches torch: no abs, no +beta_min).
        beta_val = jnp.asarray(beta, jnp.float32)
    alpha = 1.0 / beta_val
    scalars = jnp.stack([0.5 * alpha, alpha, -alpha])

    br = _pick_block_rows(rows, itemsize)
    grid = (pl.cdiv(rows, br),)

    tile_bytes = br * _LANES * itemsize
    # 2x double-buffered (input + output) tiles plus headroom; safe on every gen.
    vmem_limit = int(min(32 << 20, max(8 << 20, 4 * tile_bytes + (4 << 20))))

    bytes_io = 2 * n * itemsize + scalars.size * 4
    cost = pl.CostEstimate(flops=6 * n, transcendentals=n, bytes_accessed=bytes_io)

    out2d = pl.pallas_call(
        _laplace_density_kernel,
        out_shape=jax.ShapeDtypeStruct((rows, _LANES), dtype),
        grid_spec=pltpu.PrefetchScalarGridSpec(
            num_scalar_prefetch=0,
            grid=grid,
            in_specs=[
                pl.BlockSpec(memory_space=pltpu.MemorySpace.SMEM),   # scalars
                pl.BlockSpec((br, _LANES), lambda i: (i, 0)),        # sdf tile
            ],
            out_specs=pl.BlockSpec((br, _LANES), lambda i: (i, 0)),
        ),
        compiler_params=pltpu.CompilerParams(
            dimension_semantics=("parallel",),
            vmem_limit_bytes=vmem_limit,
        ),
        cost_estimate=cost,
    )(scalars, x2d)

    if n_lane_padded != n:
        out = out2d.reshape(-1)[:n].reshape(orig_shape)
    else:
        out = out2d.reshape(orig_shape)
    return out


def _reference(sdf, beta_val):
    alpha = 1.0 / jnp.asarray(beta_val, jnp.float32)
    x = sdf.astype(jnp.float32)
    out = alpha * (0.5 + 0.5 * jnp.sign(x)
                   * jnp.expm1(-jnp.abs(x) * (1.0 / jnp.asarray(beta_val, jnp.float32))))
    return out.astype(sdf.dtype)


if __name__ == "__main__":
    # Deterministic parameter init (params_init={"beta": 0.1}), beta_min=1e-4.
    beta_param = 0.1
    beta_min = 1e-4
    beta_eff = abs(beta_param) + beta_min

    key = jax.random.PRNGKey(0)
    k0, k1, k2, k3 = jax.random.split(key, 4)

    # Typical LaplaceDensity input: per-point SDF values of shape [N, 1].
    sdf = jax.random.normal(k0, (2048, 1), dtype=jnp.float32) * 0.5
    out = jax.block_until_ready(laplace_density(sdf, beta_param, beta=None,
                                                beta_min=beta_min))
    ref = _reference(sdf, beta_eff)
    assert out.shape == sdf.shape and out.dtype == sdf.dtype
    assert jnp.allclose(out, ref, rtol=1e-5, atol=1e-5), (
        f"max abs err = {jnp.max(jnp.abs(out - ref))}"
    )

    # Explicit-beta path + non-lane-multiple size (exercises the <=127 tail pad).
    sdf2 = jax.random.normal(k1, (777,), dtype=jnp.float32)
    out2 = jax.block_until_ready(laplace_density(sdf2, beta_param, beta=0.25))
    ref2 = _reference(sdf2, 0.25)
    assert jnp.allclose(out2, ref2, rtol=1e-5, atol=1e-5)

    # Multi-step grid + partial trailing row-block (rows % br != 0), no wrapper pad.
    sdf3 = jax.random.normal(k2, (100, 33), dtype=jnp.float32)
    out3 = jax.block_until_ready(laplace_density(sdf3, beta_param, beta=None,
                                                 beta_min=beta_min))
    ref3 = _reference(sdf3, beta_eff)
    assert jnp.allclose(out3, ref3, rtol=1e-5, atol=1e-5)

    # Native bf16 I/O path (half HBM bytes; dtype-scaled block rows).
    sdf4 = (jax.random.normal(k3, (1024, 4), dtype=jnp.float32) * 0.5).astype(jnp.bfloat16)
    out4 = jax.block_until_ready(laplace_density(sdf4, beta_param, beta=None,
                                                 beta_min=beta_min))
    ref4 = _reference(sdf4, beta_eff)
    assert out4.dtype == jnp.bfloat16
    assert jnp.allclose(out4.astype(jnp.float32), ref4.astype(jnp.float32),
                        rtol=2e-2, atol=2e-2)

    print("KERNEL_OK")
</pallas_src>

<mosaic_0001>
module attributes {stable_mosaic.version = 11 : i64} {
  func.func @_laplace_density_kernel(%arg0: i32, %arg1: memref<3xf32, #tpu.memory_space<smem>>, %arg2: memref<8x128xf32, #tpu.memory_space<vmem>>, %arg3: memref<8x128xf32, #tpu.memory_space<vmem>>) attributes {dimension_semantics = [#tpu.dimension_semantics<parallel>], iteration_bounds = array<i64: 2>, scalar_prefetch = 0 : i64, scratch_operands = 0 : i64, tpu.core_type = #tpu.core_type<tc>, window_params = [{transform_indices = @transform_0, window_bounds = array<i64: 3>}, {transform_indices = @transform_1, window_bounds = array<i64: 8, 128>}, {transform_indices = @transform_2, window_bounds = array<i64: 8, 128>}]} {
    %c0 = arith.constant 0 : index
    %0 = memref.load %arg1[%c0] : memref<3xf32, #tpu.memory_space<smem>>
    %c1 = arith.constant 1 : index
    %1 = memref.load %arg1[%c1] : memref<3xf32, #tpu.memory_space<smem>>
    %c2 = arith.constant 2 : index
    %2 = memref.load %arg1[%c2] : memref<3xf32, #tpu.memory_space<smem>>
    %c0_0 = arith.constant 0 : index
    %c0_1 = arith.constant 0 : index
    %3 = vector.load %arg2[%c0_0, %c0_1] : memref<8x128xf32, #tpu.memory_space<vmem>>, vector<8x128xf32>
    %4 = math.absf %3 : vector<8x128xf32>
    %5 = vector.broadcast %2 : f32 to vector<8x128xf32>
    %6 = arith.mulf %4, %5 : vector<8x128xf32>
    %7 = math.exp %6 : vector<8x128xf32>
    %cst = arith.constant 0.000000e+00 : f32
    %8 = vector.broadcast %cst : f32 to vector<8x128xf32>
    %9 = arith.cmpf oge, %3, %8 : vector<8x128xf32>
    %10 = vector.broadcast %0 : f32 to vector<8x128xf32>
    %11 = arith.mulf %10, %7 : vector<8x128xf32>
    %12 = vector.broadcast %0 : f32 to vector<8x128xf32>
    %13 = arith.mulf %12, %7 : vector<8x128xf32>
    %14 = vector.broadcast %1 : f32 to vector<8x128xf32>
    %15 = arith.subf %14, %13 : vector<8x128xf32>
    %16 = arith.select %9, %11, %15 : vector<8x128xi1>, vector<8x128xf32>
    %c0_2 = arith.constant 0 : index
    %c0_3 = arith.constant 0 : index
    %17 = vector.load %arg3[%c0_2, %c0_3] : memref<8x128xf32, #tpu.memory_space<vmem>>, vector<8x128xf32>
    tpu.vector_store %arg3[%c0_2, %c0_3], %16 {strides = array<i32>} : memref<8x128xf32, #tpu.memory_space<vmem>>, vector<8x128xf32>,
    return
  }
  func.func @transform_0(%arg0: i32) -> i32 {
    %c0_i32 = arith.constant 0 : i32
    %c0_i32_0 = arith.constant 0 : i32
    return %c0_i32 : i32
  }
  func.func @transform_1(%arg0: i32) -> (i32, i32) {
    %c0_i32 = arith.constant 0 : i32
    %c0_i32_0 = arith.constant 0 : i32
    return %arg0, %c0_i32 : i32, i32
  }
  func.func @transform_2(%arg0: i32) -> (i32, i32) {
    %c0_i32 = arith.constant 0 : i32
    %c0_i32_0 = arith.constant 0 : i32
    return %arg0, %c0_i32 : i32, i32
  }
}

</mosaic_0001>

<bundles_post_ra>
// kernel: tpu_custom_call.1
= control target key start
LH: loop header
LB: loop body
LE: loop exit
PB: predicated region body
PF: predicated region fallthrough
CT: control target
= control target key end

     0   :  { %7 = vsyncpa [#allocation5], 0  ;;  %s637_s0 = inlined_call_operand.hbm [shape: f32[3], index: 0, kind: input, shape index: {}]   ;;  %s638_s1 = inlined_call_operand.hbm [shape: f32[16,128], index: 1, kind: input, shape index: {}]   ;;  %s639_s2 = inlined_call_operand.hbm [shape: f32[16,128], index: 2, kind: output, shape index: {}]  }
   0x1   :  { %8 = vsyncpa [#allocation3], 0 }
   0x2   :  { %10 = vsyncpa [#allocation3 + $0x1], 0 }
   0x3   :  { %11 = vsyncpa [#allocation4], 0 }
   0x4   :  { %13 = vsyncpa [#allocation4 + $0x1], 0  ;;  %s485_s9 = smov 0   ;;  %s487_s10 = smov 0  }
   0x5   :  { %s489_s11 = smov 0   ;;  %s491_s12 = smov 0  }
   0x6 LB: > { %s506_s13 = sadd.s32 4294967295, %s465_s12   ;;  %s283_s14 = sadd.s32 4294967294, %s465_s12   ;;  %s465_s12 = sphi %s491_s12, %s659_s12   ;;  %s461_s11 = sphi %s489_s11, %s658_s11   ;;  %s457_s10 = sphi %s487_s10, %s657_s10   ;;  %s453_s9 = sphi %s485_s9, %s656_s9  }
   0x7   : > { %p60_p0 = scmp.ne.s32.totalorder %s457_s10, %s453_s9  ;;  %p640_p1 = scmp.eq.s32.totalorder %s506_s13, 0 }
   0x8   : > { %p84_p2 = scmp.eq.s32.totalorder %s506_s13, 1  ;;  %p90_p3 = scmp.eq.s32.totalorder %s283_s14, 1 }
   0x9   : > { %p515_p4 = por %p640_p1, %p60_p0  ;;  %p284_p5 = scmp.ge.s32.totalorder %s465_s12, 1 }
   0xa   : > { %p520_p6 = por %p90_p3, %p60_p0  ;;  %p97_p7 = scmp.lt.s32.totalorder %s465_s12, 3 }
   0xb   : > { %s644_s15 = scalar_select %p515_p4, 1, 0 }
   0xc   : > { %s645_s16 = scalar_select %p520_p6, 1, 0 }
   0xd   : > { %p525_p8 = pnand %p284_p5, %p97_p7  ;;  %s531_s18 = sadd.s32 1, %s465_s12  }
   0xe   : > { %s44_s19 = ssub.s32 %s465_s12, %s531_s18  ;;  %s47_s20 = sadd.s32 1, %s461_s11 }
   0xf   : > { %s646_s17 = scalar_select %p525_p8, 1, 0 }
  0x10   : > { %p307_p10 = pneg %p525_p8  ;;  %p45_p12 = scmp.eq.s32.totalorder %s44_s19, 0 }
  0x11   : > { %p54_p13 = scmp.ne.s32.totalorder %s461_s11, %s457_s10  ;;  %p55_p0 = scmp.eq.s32.totalorder %s465_s12, 0 }
  0x12   : > { %p308_p11 = pnand %p307_p10, %p640_p1  ;;  %p320_p3 = scmp.lt.s32.totalorder %s465_s12, 2 }
  0x13   : > { %s467_s21 = smov [#allocation2]   ;;  %p56_p5 = por %p55_p0, %p54_p13 }
  0x14   : > { %310 = dma.hbm_to_smem (!%p308_p11), %s637_s0, 16, %s467_s21, [#allocation5]  }
  0x15   : > { %s548_s24 = scalar_select %p45_p12, %s461_s11, %s47_s20  }
  0x16   : > { %p552_p7 = por %p84_p2, %p54_p13  ;;  %s119_s26 = sand.u32 1, %s461_s11  }
  0x17   : > { %s288_s27 = sshll.u32 %s465_s12, 7  ;;  %s287_s28 = sshll.u32 %s119_s26, 3 }
  0x18   : > { %s647_s25 = scalar_select %p552_p7, 1, 0 }
  0x19   : > { %s561_s3 = scalar_lea.hbm %s638_s1, %s288_s27  ;;  %s123_s4 = scalar_lea.vmem [#allocation6], %s287_s28 }
  0x1a   : > { %s130_s5 = sshll.u32 %s123_s4, 4  ;;  %p563_p10 = pnand %p320_p3, %p56_p5  ;;  %s131_s5 = int_to_ptr.vmem [resolvable:$true] %s130_s5 }
  0x1b   : > { %s120_s7 = scalar_lea.sflag [#allocation3], %s119_s26  ;;  %s369_s8 = scalar_lea.hbm %s561_s3, 128 }
  0x1c   : > { %p370_p2 = scmp.ne.s32.totalorder %s561_s3, %s369_s8  ;;  %p371_p11 = pneg %p563_p10 }
  0x1d   : > { %s374_s20 = scalar_lea.hbm %s638_s1, 256  ;;  %p375_p0 = scmp.lt.s32.totalorder %s561_s3, %s638_s1 }
  0x1e   : > { %p372_p12 = pnand %p371_p11, %p370_p2  ;;  %p376_p3 = scmp.lt.s32.totalorder %s374_s20, %s369_s8 }
  0x20   : > { %p373_p13 = pneg %p372_p12  ;;  %p377_p5 = por %p376_p3, %p375_p0 }
  0x22   : > { %p378_p9 = pnand %p377_p5, %p373_p13 }
  0x24   : > { %381 = shalt.err (!%p378_p9)
}
  0x25   : > { %s382_s23 = scalar_lea.vmem %s131_s5, 128  ;;  %s468_s26 = smov [#allocation6]  }
  0x26   : > { %p383_p1 = scmp.ne.s32.totalorder %s131_s5, %s382_s23  ;;  %s387_s27 = sshll.u32 %s468_s26, 4  ;;  %s388_s27 = int_to_ptr.vmem [resolvable:$false] %s387_s27 }
  0x27   : > { %s389_s28 = scalar_lea.vmem %s388_s27, 256  ;;  %p390_p2 = scmp.lt.s32.totalorder %s131_s5, %s388_s27 }
  0x28   : > { %p385_p6 = pnand %p383_p1, %p371_p11  ;;  %p391_p12 = scmp.lt.s32.totalorder %s389_s28, %s382_s23 }
  0x2a   : > { %p386_p7 = pneg %p385_p6  ;;  %p392_p4 = por %p391_p12, %p390_p2 }
  0x2c   : > { %p393_p8 = pnand %p392_p4, %p386_p7 }
  0x2e   : > { %396 = shalt.err (!%p393_p8)
}
  0x2f   : > { %314 = dma.hbm_to_vmem [thread:$0]  (!%p563_p10), %s561_s3, 128, %s131_s5, %s120_s7  }
  0x30   : > { %p649_p13 = scmp.ne.s32.totalorder %s646_s17, 0 }
  0x31   : > { %p650_p9 = scmp.eq.s32.totalorder (!%p649_p13), %s506_s13, 0 }
  0x32   : > { %139 = sbr.rel (%p649_p13) target bundleno = 105 (0x69), region = 28 }
  0x37   : > { %440 = dma.done.wait (%p650_p9), [#allocation5], 16   ;;  %p651_p1 = pmov %p650_p9 }
  0x38   : > { %s588_s29 = sand.u32 1, %s457_s10   ;;  %p652_p4 = scmp.ne.s32.totalorder %s644_s15, 0 }
  0x39   : > { %442 = vsyncadd (%p651_p1), [#allocation5], 4294967280  ;;  %s291_s30 = sshll.u32 %s588_s29, 3  ;;  %s146_s4 = scalar_lea.sflag [#allocation3], %s588_s29 }
  0x3a   : > { %s149_s6 = scalar_lea.vmem [#allocation6], %s291_s30 }
  0x3b   : > { %444 = dma.done.wait (%p652_p4), %s146_s4, 128  }
  0x3c   : > { %446 = vsyncadd (%p652_p4), %s146_s4, 4294967168 }
  0x3d   : > { %154 = sfence }
  0x3e   : > { %s294_s17 = sld [smem:[#allocation2 + $0x2]]  ;;  %v174_v0 = vld [vmem:[%s149_s6] sm:$0xff]  ;;  %s170_s7 = scalar_lea.vmem [#allocation7], %s291_s30 }
  0x3f   : > { %v175_v1 = vand.u32 2147483647, %v174_v0  ;;  %s171_s3 = sld [smem:[#allocation2]]  ;;  %s201_s8 = sshll.u32 %s170_s7, 4  ;;  %vm180_vm0 = vcmp.ge.f32.partialorder %v174_v0, 0.0  ;;  %s597_s8 = int_to_ptr.vmem [resolvable:$true] %s201_s8 }
  0x40   : > { %s293_s5 = sld [smem:[#allocation2 + $0x1]]  ;;  %s296_s15 = sshll.u32 %s506_s13, 7 }
  0x41   : > { %s199_s20 = scalar_lea.hbm %s639_s2, %s296_s15  ;;  %s188_s21 = scalar_lea.sflag [#allocation4], %s588_s29 }
  0x42   : > { %s397_s22 = scalar_lea.vmem %s597_s8, 128  ;;  %p653_p8 = scmp.ne.s32.totalorder %s647_s25, 0 }
  0x43   : > { %p398_p6 = scmp.ne.s32.totalorder %s597_s8, %s397_s22  ;;  %s469_s13 = smov [#allocation7]  }
  0x44   : > { %v176_v2 = vstv %s294_s17  ;;  %s401_s23 = sshll.u32 %s469_s13, 4  ;;  %s402_s23 = int_to_ptr.vmem [resolvable:$false] %s401_s23 }
  0x45   : > { %v177_v3 = vmul.f32 %v176_v2, %v175_v1  ;;  %v181_v5 = vstv %s171_s3  ;;  %p399_p7 = pnand %p398_p6, %p653_p8  ;;  %s403_s26 = scalar_lea.vmem %s402_s23, 256 }
  0x46   : > { %v183_v7 = vstv %s293_s5  ;;  %p404_p11 = scmp.lt.s32.totalorder %s597_s8, %s402_s23  ;;  %p405_p0 = scmp.lt.s32.totalorder %s403_s26, %s397_s22 }
  0x47   : > { %v178_v4 = vmul.f32 1.442695, %v177_v3  ;;  %p400_p10 = pneg %p399_p7 }
  0x48   : > { %p406_p3 = por %p405_p0, %p404_p11 }
  0x49   : > { %356 = vpow2.f32 %v178_v4 }
  0x4a   : > { %p407_p5 = pnand %p406_p3, %p400_p10 }
  0x56   : > { %v357_v6 = vpop.eup %356 }
  0x57   : > { %v182_v8 = vmul.f32 %v357_v6, %v181_v5 }
  0x59   : > { %v184_v9 = vsub.f32 %v183_v7, %v182_v8 }
  0x5b   : > { %v185_v10 = vsel %vm180_vm0, %v182_v8, %v184_v9 }
  0x5c   : > { %186 = vst [vmem:[%s170_s7] sm:$0xff] %v185_v10 }
  0x5d   : > { %410 = shalt.err (!%p407_p5)
}
  0x5e   : > { %s411_s27 = scalar_lea.hbm %s199_s20, 128  ;;  %s415_s30 = scalar_lea.hbm %s639_s2, 256 }
  0x5f   : > { %p412_p2 = scmp.ne.s32.totalorder %s199_s20, %s411_s27  ;;  %p416_p9 = scmp.lt.s32.totalorder %s199_s20, %s639_s2 }
  0x60   : > { %p417_p1 = scmp.lt.s32.totalorder %s415_s30, %s411_s27 }
  0x61   : > { %p413_p12 = pnand %p412_p2, %p653_p8 }
  0x62   : > { %p418_p4 = por %p417_p1, %p416_p9 }
  0x63   : > { %p414_p13 = pneg %p413_p12 }
  0x65   : > { %p419_p6 = pnand %p418_p4, %p414_p13 }
  0x67   : > { %422 = shalt.err (!%p419_p6)
}
  0x68   : > { %305 = dma.vmem_to_hbm [thread:$0]  (%p653_p8), %s597_s8, 128, %s199_s20, %s188_s21  }
  0x69 PF: > { %s213_s17 = sand.u32 1, %s453_s9   ;;  %p654_p7 = scmp.ne.s32.totalorder %s645_s16, 0 }
  0x6a   : > { %p655_p10 = scmp.ge.s32.totalorder %s465_s12, 2  ;;  %s214_s3 = scalar_lea.sflag [#allocation4], %s213_s17 }
  0x6c   : > { %p316_p11 = pnand %p655_p10, %p654_p7 }
  0x6e   : > { %p317_p0 = pneg %p316_p11 }
  0x70   : > { %448 = dma.done.wait (%p317_p0), %s214_s3, 128  }
  0x71   : > { %450 = vsyncadd (%p317_p0), %s214_s3, 4294967168  ;;  %p16_p3 = scmp.ge.s32.totalorder %s531_s18, 4   ;;  %s656_s9 = smov %s457_s10 }
  0x72   : > { %s657_s10 = smov %s461_s11  ;;  %s658_s11 = smov %s548_s24 }
  0x73   : > { %s659_s12 = smov %s531_s18  ;;  %18 = sbr.rel (!%p16_p3) target bundleno = 6 (0x6), region = 78 }
  0x78   :  { %219 = vsyncpa [#allocation3], 1 }
  0x79   :  { %221 = vsyncpa [#allocation3 + $0x1], 1 }
  0x7a   :  { %222 = vsyncpa [#allocation4], 1 }
  0x7b   :  { %224 = vsyncpa [#allocation4 + $0x1], 1 }
  0x7c   :  { %225 = vsyncpa [#allocation5], 1 }
  0x7d   :  { %227 = vsyncpa [#allocation5 + $0x1], 1 }

</bundles_post_ra>
